<compile_context>
chip_gen: v7x
topology: tpu7x:2x2x1
jax: 0.10.0
libtpu: 0.0.40
codegen_flags: <defaults>
</compile_context>

<pallas_src>
import functools

import jax
import jax.numpy as jnp
from jax.experimental import pallas as pl
from jax.experimental.pallas import tpu as pltpu

IN_FEATURES = 98
OUT_FEATURES = 7
NEG_SLOPE = 0.01            # nn.LeakyReLU default


def _round_up(n, m):
    return ((n + m - 1) // m) * m


def _pick_default_block_b():
    # v5e has a 16 MiB default scoped VMEM; cap its tile at 4096 (~8 MiB of
    # double-buffered, lane-padded tiles). v6e/v7x default to 8192 (~16 MiB).
    try:
        kind = jax.devices()[0].device_kind.lower()
    except Exception:
        return 8192
    return 4096 if "v5" in kind else 8192


DEFAULT_BLOCK_B = _pick_default_block_b()


def _linear_leakyrelu_kernel(x_ref, w_ref, b_ref, o_ref):
    # x_ref: (TB, 98), w_ref: (98, 7), b_ref: (1, 7), o_ref: (TB, 7)
    y = jnp.dot(x_ref[...], w_ref[...],
                preferred_element_type=jnp.float32) + b_ref[...]
    # LeakyReLU (0 < slope < 1): max(y, slope*y) -> single VPU op.
    o_ref[...] = jnp.maximum(y, NEG_SLOPE * y).astype(o_ref.dtype)


def prepare_params(weight, bias):
    """One-time layout prep: weight (7, 98) PyTorch layout -> (98, 7); bias -> (1, 7)."""
    w_t = jnp.asarray(weight).T.astype(jnp.float32)               # (98, 7)
    b2d = jnp.asarray(bias).reshape(1, OUT_FEATURES).astype(jnp.float32)
    return w_t, b2d


@functools.partial(jax.jit, static_argnames=("block_b",))
def heuristic_forward(x, w_t, b2d, *, block_b=DEFAULT_BLOCK_B):
    """x: (B, 98) f32, w_t: (98, 7) f32, b2d: (1, 7) f32 -> (B, 7) f32."""
    B = x.shape[0]

    # Batch tile: multiple of 8, no larger than needed for small batches.
    tb = min(block_b, _round_up(max(B, 1), 8))
    tb = _round_up(tb, 8)

    # No padding: Pallas clips the partial last block (block_shape last dims
    # are either multiples of 8 or equal to the full array dims).
    grid = (pl.cdiv(B, tb),)

    cost = pl.CostEstimate(
        flops=2 * B * IN_FEATURES * OUT_FEATURES,
        transcendentals=0,
        bytes_accessed=B * (IN_FEATURES + OUT_FEATURES) * 4
        + (IN_FEATURES * OUT_FEATURES + OUT_FEATURES) * 4,
    )

    return pl.pallas_call(
        _linear_leakyrelu_kernel,
        out_shape=jax.ShapeDtypeStruct((B, OUT_FEATURES), jnp.float32),
        grid=grid,
        in_specs=[
            pl.BlockSpec((tb, IN_FEATURES), lambda i: (i, 0)),
            pl.BlockSpec((IN_FEATURES, OUT_FEATURES), lambda i: (0, 0)),
            pl.BlockSpec((1, OUT_FEATURES), lambda i: (0, 0)),
        ],
        out_specs=pl.BlockSpec((tb, OUT_FEATURES), lambda i: (i, 0)),
        compiler_params=pltpu.CompilerParams(
            dimension_semantics=("parallel",),
        ),
        cost_estimate=cost,
    )(x, w_t, b2d)


if __name__ == "__main__":
    key = jax.random.PRNGKey(0)
    k_x, k_w, k_b = jax.random.split(key, 3)

    # Small shapes consistent with the module: batch=8, in_features=98.
    B = 8
    x = jax.random.normal(k_x, (B, IN_FEATURES), dtype=jnp.float32)

    # Deterministic param init mimicking nn.Linear default:
    # uniform(-1/sqrt(in_features), 1/sqrt(in_features))
    bound = 1.0 / (IN_FEATURES ** 0.5)
    weight = jax.random.uniform(
        k_w, (OUT_FEATURES, IN_FEATURES), dtype=jnp.float32,
        minval=-bound, maxval=bound)
    bias = jax.random.uniform(
        k_b, (OUT_FEATURES,), dtype=jnp.float32, minval=-bound, maxval=bound)

    w_t, b2d = prepare_params(weight, bias)

    out = heuristic_forward(x, w_t, b2d)
    out = jax.block_until_ready(out)

    # Reference check in plain JAX.
    ref = x @ weight.T + bias
    ref = jnp.where(ref >= 0, ref, NEG_SLOPE * ref)
    assert out.shape == (B, OUT_FEATURES)
    assert jnp.allclose(out, ref, atol=1e-5, rtol=1e-5)

    # Ragged-tail sanity check (B not a multiple of 8): exercises the clipped
    # partial last block (no padding path anymore).
    B2 = 13
    x2 = jax.random.normal(jax.random.PRNGKey(1), (B2, IN_FEATURES),
                           dtype=jnp.float32)
    out2 = jax.block_until_ready(heuristic_forward(x2, w_t, b2d))
    ref2 = x2 @ weight.T + bias
    ref2 = jnp.where(ref2 >= 0, ref2, NEG_SLOPE * ref2)
    assert out2.shape == (B2, OUT_FEATURES)
    assert jnp.allclose(out2, ref2, atol=1e-5, rtol=1e-5)

    # Multi-block sanity check with a small explicit tile (forces >1 grid step
    # and a partial last block) while keeping shapes small.
    B3 = 37
    x3 = jax.random.normal(jax.random.PRNGKey(2), (B3, IN_FEATURES),
                           dtype=jnp.float32)
    out3 = jax.block_until_ready(heuristic_forward(x3, w_t, b2d, block_b=16))
    ref3 = x3 @ weight.T + bias
    ref3 = jnp.where(ref3 >= 0, ref3, NEG_SLOPE * ref3)
    assert out3.shape == (B3, OUT_FEATURES)
    assert jnp.allclose(out3, ref3, atol=1e-5, rtol=1e-5)

    print("KERNEL_OK")
</pallas_src>

<mosaic_0001>
module attributes {stable_mosaic.version = 11 : i64} {
  func.func @_linear_leakyrelu_kernel(%arg0: i32, %arg1: memref<8x98xf32, #tpu.memory_space<vmem>>, %arg2: memref<98x7xf32, #tpu.memory_space<vmem>>, %arg3: memref<1x7xf32, #tpu.memory_space<vmem>>, %arg4: memref<8x7xf32, #tpu.memory_space<vmem>>) attributes {dimension_semantics = [#tpu.dimension_semantics<parallel>], iteration_bounds = array<i64: 1>, scalar_prefetch = 0 : i64, scratch_operands = 0 : i64, tpu.core_type = #tpu.core_type<tc>, window_params = [{transform_indices = @transform_0, window_bounds = array<i64: 8, 98>}, {pipeline_mode = #tpu.pipeline_mode<synchronous>, transform_indices = @transform_1, window_bounds = array<i64: 98, 7>}, {pipeline_mode = #tpu.pipeline_mode<synchronous>, transform_indices = @transform_2, window_bounds = array<i64: 1, 7>}, {transform_indices = @transform_3, window_bounds = array<i64: 8, 7>}]} {
    %c0 = arith.constant 0 : index
    %c0_0 = arith.constant 0 : index
    %0 = vector.load %arg1[%c0, %c0_0] : memref<8x98xf32, #tpu.memory_space<vmem>>, vector<8x98xf32>
    %c0_1 = arith.constant 0 : index
    %c0_2 = arith.constant 0 : index
    %1 = vector.load %arg2[%c0_1, %c0_2] : memref<98x7xf32, #tpu.memory_space<vmem>>, vector<98x7xf32>
    %cst = arith.constant dense<0.000000e+00> : vector<8x7xf32>
    %2 = tpu.matmul %0, %1, %cst {dimension_numbers = #tpu.dot_dimension_numbers<[1], [0], [0], [1], [0, 0, 1, 1], [], []>} : vector<8x98xf32>, vector<98x7xf32>, vector<8x7xf32> -> vector<8x7xf32>
    %c0_3 = arith.constant 0 : index
    %c0_4 = arith.constant 0 : index
    %3 = vector.load %arg3[%c0_3, %c0_4] : memref<1x7xf32, #tpu.memory_space<vmem>>, vector<1x7xf32>
    %4 = vector.broadcast %3 : vector<1x7xf32> to vector<8x7xf32>
    %5 = arith.addf %2, %4 : vector<8x7xf32>
    %cst_5 = arith.constant 0.00999999977 : f32
    %6 = vector.broadcast %cst_5 : f32 to vector<8x7xf32>
    %7 = arith.mulf %6, %5 : vector<8x7xf32>
    %8 = arith.maximumf %5, %7 : vector<8x7xf32>
    %c0_6 = arith.constant 0 : index
    %c0_7 = arith.constant 0 : index
    %9 = vector.load %arg4[%c0_6, %c0_7] : memref<8x7xf32, #tpu.memory_space<vmem>>, vector<8x7xf32>
    tpu.vector_store %arg4[%c0_6, %c0_7], %8 {strides = array<i32>} : memref<8x7xf32, #tpu.memory_space<vmem>>, vector<8x7xf32>,
    return
  }
  func.func @transform_0(%arg0: i32) -> (i32, i32) {
    %c0_i32 = arith.constant 0 : i32
    %c0_i32_0 = arith.constant 0 : i32
    return %arg0, %c0_i32 : i32, i32
  }
  func.func @transform_1(%arg0: i32) -> (i32, i32) {
    %c0_i32 = arith.constant 0 : i32
    %c0_i32_0 = arith.constant 0 : i32
    %c0_i32_1 = arith.constant 0 : i32
    return %c0_i32, %c0_i32_0 : i32, i32
  }
  func.func @transform_2(%arg0: i32) -> (i32, i32) {
    %c0_i32 = arith.constant 0 : i32
    %c0_i32_0 = arith.constant 0 : i32
    %c0_i32_1 = arith.constant 0 : i32
    return %c0_i32, %c0_i32_0 : i32, i32
  }
  func.func @transform_3(%arg0: i32) -> (i32, i32) {
    %c0_i32 = arith.constant 0 : i32
    %c0_i32_0 = arith.constant 0 : i32
    return %arg0, %c0_i32 : i32, i32
  }
}

</mosaic_0001>

<bundles_post_ra>
// kernel: heuristic_forward.1
= control target key start
LH: loop header
LB: loop body
LE: loop exit
PB: predicated region body
PF: predicated region fallthrough
CT: control target
= control target key end

     0   :  { %v224_v3 = vmov 0.0|0.0   ;;  %vm225_vm0 = vmmov 0   ;;  %v226_v6 = vmov 0.0   ;;  %s305_s0 = inlined_call_operand.vmem [shape: f32[8,98], index: 0, kind: input, shape index: {}]   ;;  %s306_s1 = inlined_call_operand.vmem [shape: f32[98,7], index: 1, kind: input, shape index: {}]   ;;  %s307_s2 = inlined_call_operand.vmem [shape: f32[1,7], index: 2, kind: input, shape index: {}]   ;;  %s308_s3 = inlined_call_operand.hbm [shape: f32[8,7], index: 3, kind: output, shape index: {}]  }
   0x1   :  { %v16_v0 = vld [vmem:[%s306_s1] sm:$0xff]  ;;  %v17_v1 = vld [vmem:[%s306_s1 + $0x8] sm:$0xff]  ;;  %v18_v2 = vld [vmem:[%s306_s1 + $0x10] sm:$0xff]  ;;  %178 = vmatprep.subr.bf16.mxu0 %v224_v3  ;;  %175 = vmatprep.mubr.msk.f32.mxu0 %vm225_vm0, %v226_v6 }
   0x2   :  { %v179_v4 = vpack.c.bf16 %v17_v1, %v16_v0  ;;  %v19_v5 = vld [vmem:[%s306_s1 + $0x18] sm:$0xff]  ;;  %v20_v8 = vld [vmem:[%s306_s1 + $0x20] sm:$0xff]  ;;  %v21_v9 = vld [vmem:[%s306_s1 + $0x28] sm:$0xff] }
   0x3   :  { %v182_v7 = vpack.c.bf16 %v19_v5, %v18_v2 }
   0x4   :  { %180 = vmatpush3.bf16.msra.mxu0 %v179_v4 }
   0x5   :  { %181 = vmatprep.subr.bf16.mxu0 %v224_v3 }
   0x6   :  { %8 = vsyncpa [#allocation3], 0  ;;  %v185_v10 = vpack.c.bf16 %v21_v9, %v20_v8  ;;  %v22_v11 = vld [vmem:[%s306_s1 + $0x30] sm:$0xff]  ;;  %v23_v12 = vld [vmem:[%s306_s1 + $0x38] sm:$0xff]  ;;  %vm40_vm1 = vcmask 1041408   ;;  %vm36_vm2 = vcmask 801792  }
   0x7   :  { %v188_v13 = vpack.c.bf16 %v23_v12, %v22_v11  ;;  %v24_v14 = vld [vmem:[%s306_s1 + $0x40] sm:$0xff]  ;;  %v25_v15 = vld [vmem:[%s306_s1 + $0x48] sm:$0xff]  ;;  %v26_v17 = vld [vmem:[%s306_s1 + $0x50] sm:$0xff]  ;;  %s227_s15 = smov [#allocation2]   ;;  %vm116_vm3 = vcmask 56320  }
   0x8   :  { %183 = vmatpush3.bf16.msra.mxu0 %v182_v7  ;;  %v191_v16 = vpack.c.bf16 %v25_v15, %v24_v14  ;;  %v27_v18 = vld [vmem:[%s306_s1 + $0x58] sm:$0xff]  ;;  %v28_v20 = vld [vmem:[%s306_s1 + $0x60] sm:$0x3]  ;;  %s124_s16 = sshll.u32 %s227_s15, 4  ;;  %s125_s16 = int_to_ptr.vmem [resolvable:$true] %s124_s16 }
   0x9   :  { %184 = vmatprep.subr.bf16.mxu0 %v224_v3  ;;  %v194_v19 = vpack.c.bf16 %v27_v18, %v26_v17  ;;  %v15_v21 = vld [vmem:[%s305_s0] sm:$0xff]  ;;  %s200_s1 = scalar_lea.vmem %s125_s16, 128  ;;  %p205_p1 = scmp.lt.s32.totalorder %s125_s16, %s125_s16 }
   0xa   :  { %v132_v22 = vld [vmem:[%s307_s2] ss:$0 sm:$0xff]  ;;  %p201_p0 = scmp.ne.s32.totalorder %s125_s16, %s200_s1  ;;  %p206_p2 = scmp.lt.s32.totalorder %s200_s1, %s200_s1 }
   0xc   :  { %186 = vmatpush3.bf16.msra.mxu0 %v185_v10  ;;  %p207_p3 = por %p206_p2, %p205_p1 }
   0xd   :  { %187 = vmatprep.subr.bf16.mxu0 %v224_v3 }
   0xe   :  { %p208_p4 = pnand %p207_p3, %p201_p0 }
  0x10   :  { %189 = vmatpush3.bf16.msra.mxu0 %v188_v13 }
  0x11   :  { %190 = vmatprep.subr.bf16.mxu0 %v224_v3 }
  0x14   :  { %192 = vmatpush3.bf16.msra.mxu0 %v191_v16 }
  0x15   :  { %193 = vmatprep.subr.bf16.mxu0 %v224_v3 }
  0x18   :  { %195 = vmatpush3.bf16.msra.mxu0 %v194_v19 }
  0x19   :  { %173 = vmatprep.subr.mxu0 %v226_v6 }
  0x1c   :  { %174 = vmatpush3.msk.msra.mxu0 %vm40_vm1, %v28_v20 }
  0x1d   :  { %176 = vmatmul.mubr.msk.f32.vlgmr.msra.gmra.mrb[0].mxu0 %vm36_vm2, %v15_v21 }
  0xf0   :  { %v110_v23 = vpop.f32.mrb[0].mxu0 }
  0xf1   :  { %v111_v24 = vadd.f32 %v132_v22, %v110_v23  ;;  %v177_v25 = vpop.f32.mrb[1].mxu0 }
  0xf3   :  { %v114_v26 = vmul.f32 0.01, %v111_v24 }
  0xf5   :  { %v115_v27 = vmax.f32 %v111_v24, %v114_v26 }
  0xf7   :  { %117 = vst.msk [vmem:[#allocation2] sm:$0xff] %vm116_vm3, %v115_v27 }
  0xf8   :  { %211 = shalt.err (!%p208_p4)
}
  0xf9   :  { %s212_s2 = scalar_lea.hbm %s308_s3, 128 }
  0xfa   :  { %p213_p5 = scmp.ne.s32.totalorder %s308_s3, %s212_s2  ;;  %p216_p6 = scmp.lt.u32.totalorder %s212_s2, %s308_s3 }
  0xfc   :  { %p218_p7 = pnand %p216_p6, %p213_p5 }
  0xfe   :  { %221 = shalt.err (!%p218_p7)
}
  0xff   :  { %127 = dma.vmem_to_hbm [thread:$0]  %s125_s16, 128, %s308_s3, [#allocation3]  }
 0x100   :  { %222 = dma.done.wait [#allocation3], 128  }
 0x101   :  { %223 = vsyncadd [#allocation3], 4294967168 }
 0x102   :  { %131 = vsyncpa [#allocation3], 1 }

</bundles_post_ra>
